<compile_context>
chip_gen: v5e
topology: v5e:2x2
jax: 0.10.0
libtpu: 0.0.40
codegen_flags: <defaults>
</compile_context>

<pallas_src>
from functools import partial

import jax
import jax.numpy as jnp
from jax.experimental import pallas as pl
from jax.experimental.pallas import tpu as pltpu


def siamese_kernel(x_ref, w1_ref, b1_ref, w2_ref, out_ref):
    # x_ref : [2*Bp, Dp]  bf16   (img1 rows in [0:Bp], img2 rows in [Bp:2*Bp])
    # w1_ref: [Dp, HIDp] bf16,  b1_ref: [1, HIDp] f32,  w2_ref: [HIDp, FEATp] bf16
    # out_ref: [1, FEATp] f32   (per-lane partial sums of the squared distance)

    # Single fused first-layer matmul for both images (w1 staged once on the MXU).
    h = jnp.dot(x_ref[...], w1_ref[...], preferred_element_type=jnp.float32)
    h = jnp.maximum(h + b1_ref[...], 0.0)            # [2*Bp, HIDp] f32

    bp = h.shape[0] // 2                              # tile-aligned split (Bp % 16 == 0)
    dh = h[:bp, :] - h[bp:, :]                        # h1 - h2, free view slice

    # b2 cancels in feat1 - feat2 -> one second-layer dot on the difference.
    df = jnp.dot(dh.astype(jnp.bfloat16), w2_ref[...],
                 preferred_element_type=jnp.float32)  # [Bp, FEATp]

    # Reduce over rows only; keep per-lane partials lane-dense for an unmasked store.
    out_ref[...] = jnp.sum(df * df, axis=0, keepdims=True)


def _round_up(n, m):
    return ((n + m - 1) // m) * m


def prepare_params(w1, b1, w2, b2=None):
    """Pad/cast weights ONCE (lane-dense 128 multiples, bf16 matmul operands).

    b2 is accepted for API parity with the module but is not needed: it cancels
    exactly in feat1 - feat2.
    """
    del b2
    D, HID = w1.shape
    FEAT = w2.shape[1]
    Dp, HIDp, FEATp = _round_up(D, 128), _round_up(HID, 128), _round_up(FEAT, 128)

    w1p = jnp.pad(w1.astype(jnp.bfloat16), ((0, Dp - D), (0, HIDp - HID)))
    b1p = jnp.pad(b1.astype(jnp.float32).reshape(1, -1), ((0, 0), (0, HIDp - HID)))
    w2p = jnp.pad(w2.astype(jnp.bfloat16), ((0, HIDp - HID), (0, FEATp - FEAT)))
    return w1p, b1p, w2p


@partial(jax.jit, static_argnames=())
def siamese_forward(img1, img2, w1p, b1p, w2p):
    """img1/img2: [B, C, H, W] float32.  w1p/b1p/w2p: pre-padded params.
    Returns scalar float32 squared L2 distance between backbone features."""
    B = img1.shape[0]
    Dp, _ = w1p.shape
    FEATp = w2p.shape[1]
    D = img1.shape[1] * img1.shape[2] * img1.shape[3]
    Bp = _round_up(B, 16)  # sublane/bf16-packing aligned split point

    # One fused stack + pad + cast (row-major flatten matches torch .view).
    x = jnp.stack([img1.reshape(B, -1), img2.reshape(B, -1)], axis=0)  # [2, B, D]
    x = jnp.pad(x.astype(jnp.bfloat16), ((0, 0), (0, Bp - B), (0, Dp - D)))
    x = x.reshape(2 * Bp, Dp)                                          # [2*Bp, Dp]

    partials = pl.pallas_call(
        siamese_kernel,
        out_shape=jax.ShapeDtypeStruct((1, FEATp), jnp.float32),
        in_specs=[pl.BlockSpec(memory_space=pltpu.MemorySpace.VMEM)] * 4,
        out_specs=pl.BlockSpec(memory_space=pltpu.MemorySpace.VMEM),
    )(x, w1p, b1p, w2p)

    return jnp.sum(partials)   # finish the 128-lane reduce outside the kernel


def init_params(key, d_in, hidden, feat):
    k1, k2, k3, k4 = jax.random.split(key, 4)
    w1 = jax.random.normal(k1, (d_in, hidden), jnp.float32) * 0.02
    b1 = jax.random.normal(k2, (1, hidden), jnp.float32) * 0.02
    w2 = jax.random.normal(k3, (hidden, feat), jnp.float32) * 0.02
    b2 = jax.random.normal(k4, (1, feat), jnp.float32) * 0.02
    return w1, b1, w2, b2


def reference_forward(img1, img2, w1, b1, w2, b2):
    """Pure-JAX reference mirroring the torch module structure (two backbone
    passes, subtract, square, sum) with the same bf16 operand precision."""
    B = img1.shape[0]

    def backbone(x):
        x = x.reshape(B, -1).astype(jnp.bfloat16)
        h = jnp.dot(x, w1.astype(jnp.bfloat16), preferred_element_type=jnp.float32) + b1
        h = jnp.maximum(h, 0.0)
        f = jnp.dot(h.astype(jnp.bfloat16), w2.astype(jnp.bfloat16),
                    preferred_element_type=jnp.float32) + b2
        return f

    f1 = backbone(img1)
    f2 = backbone(img2)
    return jnp.sum((f1 - f2) ** 2)


if __name__ == "__main__":
    # Small shapes consistent with an NCHW image backbone.
    B, C, H, W = 2, 4, 16, 16
    D = C * H * W            # 1024
    HIDDEN, FEAT = 32, 32    # model dims; zero-padded to 128 in prepare_params

    key = jax.random.PRNGKey(0)
    k_img1, k_img2, k_params = jax.random.split(key, 3)

    img1 = jax.random.normal(k_img1, (B, C, H, W), jnp.float32)
    img2 = jax.random.normal(k_img2, (B, C, H, W), jnp.float32)
    w1, b1, w2, b2 = init_params(k_params, D, HIDDEN, FEAT)

    # Pad/cast weights once, outside the per-call path.
    w1p, b1p, w2p = prepare_params(w1, b1, w2, b2)

    out = siamese_forward(img1, img2, w1p, b1p, w2p)
    out = jax.block_until_ready(out)

    ref = reference_forward(img1, img2, w1, b1, w2, b2)
    assert jnp.allclose(out, ref, rtol=5e-2, atol=1e-2), (out, ref)

    print("KERNEL_OK")
</pallas_src>

<mosaic_0001>
module attributes {stable_mosaic.version = 11 : i64} {
  func.func @siamese_kernel(%arg0: memref<32x1024xbf16, #tpu.memory_space<vmem>>, %arg1: memref<1024x128xbf16, #tpu.memory_space<vmem>>, %arg2: memref<1x128xf32, #tpu.memory_space<vmem>>, %arg3: memref<128x128xbf16, #tpu.memory_space<vmem>>, %arg4: memref<1x128xf32, #tpu.memory_space<vmem>>) attributes {dimension_semantics = [], scalar_prefetch = 0 : i64, scratch_operands = 0 : i64, tpu.core_type = #tpu.core_type<tc>} {
    %c0 = arith.constant 0 : index
    %c0_0 = arith.constant 0 : index
    %0 = vector.load %arg0[%c0, %c0_0] : memref<32x1024xbf16, #tpu.memory_space<vmem>>, vector<32x1024xbf16>
    %c0_1 = arith.constant 0 : index
    %c0_2 = arith.constant 0 : index
    %1 = vector.load %arg1[%c0_1, %c0_2] : memref<1024x128xbf16, #tpu.memory_space<vmem>>, vector<1024x128xbf16>
    %cst = arith.constant dense<0.000000e+00> : vector<32x128xf32>
    %2 = tpu.matmul %0, %1, %cst {dimension_numbers = #tpu.dot_dimension_numbers<[1], [0], [0], [1], [0, 0, 1, 1], [], []>} : vector<32x1024xbf16>, vector<1024x128xbf16>, vector<32x128xf32> -> vector<32x128xf32>
    %c0_3 = arith.constant 0 : index
    %c0_4 = arith.constant 0 : index
    %3 = vector.load %arg2[%c0_3, %c0_4] : memref<1x128xf32, #tpu.memory_space<vmem>>, vector<1x128xf32>
    %4 = vector.broadcast %3 : vector<1x128xf32> to vector<32x128xf32>
    %5 = arith.addf %2, %4 : vector<32x128xf32>
    %cst_5 = arith.constant 0.000000e+00 : f32
    %6 = vector.broadcast %cst_5 : f32 to vector<32x128xf32>
    %7 = arith.maximumf %5, %6 : vector<32x128xf32>
    %8 = vector.extract_strided_slice %7 {offsets = [0, 0], sizes = [16, 128], strides = [1, 1]} : vector<32x128xf32> to vector<16x128xf32>
    %9 = vector.extract_strided_slice %7 {offsets = [16, 0], sizes = [16, 128], strides = [1, 1]} : vector<32x128xf32> to vector<16x128xf32>
    %10 = arith.subf %8, %9 : vector<16x128xf32>
    %11 = arith.truncf %10 : vector<16x128xf32> to vector<16x128xbf16>
    %c0_6 = arith.constant 0 : index
    %c0_7 = arith.constant 0 : index
    %12 = vector.load %arg3[%c0_6, %c0_7] : memref<128x128xbf16, #tpu.memory_space<vmem>>, vector<128x128xbf16>
    %cst_8 = arith.constant dense<0.000000e+00> : vector<16x128xf32>
    %13 = tpu.matmul %11, %12, %cst_8 {dimension_numbers = #tpu.dot_dimension_numbers<[1], [0], [0], [1], [0, 0, 1, 1], [], []>} : vector<16x128xbf16>, vector<128x128xbf16>, vector<16x128xf32> -> vector<16x128xf32>
    %14 = arith.mulf %13, %13 : vector<16x128xf32>
    %cst_9 = arith.constant dense<0.000000e+00> : vector<128xf32>
    %15 = vector.multi_reduction <add>, %14, %cst_9 [0] : vector<16x128xf32> to vector<128xf32>
    %16 = vector.shape_cast %15 : vector<128xf32> to vector<1x128xf32>
    %c0_10 = arith.constant 0 : index
    %c0_11 = arith.constant 0 : index
    %17 = vector.load %arg4[%c0_10, %c0_11] : memref<1x128xf32, #tpu.memory_space<vmem>>, vector<1x128xf32>
    tpu.vector_store %arg4[%c0_10, %c0_11], %16 {strides = array<i32>} : memref<1x128xf32, #tpu.memory_space<vmem>>, vector<1x128xf32>,
    return
  }
}

</mosaic_0001>

<bundles_post_ra>
// kernel: siamese_forward.1
= control target key start
LH: loop header
LB: loop body
LE: loop exit
PB: predicated region body
PF: predicated region fallthrough
CT: control target
= control target key end

     0   :  { %9 = vsyncpa [#allocation3], 0  ;;  %s1367_s18 = smov [#allocation2]   ;;  %s1368_s20 = smov 64   ;;  %s1692_s0 = inlined_call_operand.vmem [shape: bf16[32,1024], index: 0, kind: input, shape index: {}]   ;;  %s1693_s1 = inlined_call_operand.vmem [shape: bf16[1024,128], index: 1, kind: input, shape index: {}]   ;;  %s1694_s2 = inlined_call_operand.vmem [shape: f32[1,128], index: 2, kind: input, shape index: {}]   ;;  %s1695_s3 = inlined_call_operand.hbm [shape: bf16[128,128], index: 3, kind: input, shape index: {}]   ;;  %s1696_s4 = inlined_call_operand.vmem [shape: f32[1,128], index: 4, kind: output, shape index: {}]  }
   0x1   :  { %s20_s17 = sshll.u32 %s1695_s3, 4  ;;  %s22_s19 = sshll.u32 %s1367_s18, 4  ;;  %s21_s17 = int_to_ptr.hbm [resolvable:$true] %s20_s17  ;;  %s23_s19 = int_to_ptr.vmem [resolvable:$true] %s22_s19 }
   0x2   :  { %s1369_s21 = smov 4  }
   0x3   :  { %28 = dma.hbm_to_vmem [thread:$0]  %s21_s17, 1024, %s23_s19, [#allocation3], %s1368_s20, %s1368_s20, %s1369_s21  }
   0x4   :  { %1365 = dma.done.wait [#allocation3], 1024  }
   0x5   :  { %1366 = vsyncadd [#allocation3], 4294966272  ;;  %v1272_v0 = vld [vmem:[%s1693_s1 + $0x38] sm:$0xff]  ;;  %v1271_v4 = vld [vmem:[%s1693_s1 + $0x30] sm:$0xff] }
   0x6   :  { %v1280_v1 = vld [vmem:[%s1693_s1 + $0x78] sm:$0xff]  ;;  %645 = vmatpush.bf16.msra.mxu0 %v1272_v0  ;;  %v1279_v5 = vld [vmem:[%s1693_s1 + $0x70] sm:$0xff]  ;;  %v1270_v8 = vld [vmem:[%s1693_s1 + $0x28] sm:$0xff] }
   0x7   :  { %v1288_v2 = vld [vmem:[%s1693_s1 + $0xb8] sm:$0xff]  ;;  %664 = vmatpush.bf16.msra.mxu1 %v1280_v1  ;;  %v1287_v6 = vld [vmem:[%s1693_s1 + $0xb0] sm:$0xff]  ;;  %v1278_v9 = vld [vmem:[%s1693_s1 + $0x68] sm:$0xff] }
   0x8   :  { %v1296_v3 = vld [vmem:[%s1693_s1 + $0xf8] sm:$0xff]  ;;  %683 = vmatpush.bf16.msra.mxu2 %v1288_v2  ;;  %v1295_v7 = vld [vmem:[%s1693_s1 + $0xf0] sm:$0xff]  ;;  %v1286_v10 = vld [vmem:[%s1693_s1 + $0xa8] sm:$0xff] }
   0x9   :  { %702 = vmatpush.bf16.msra.mxu3 %v1296_v3  ;;  %v1294_v11 = vld [vmem:[%s1693_s1 + $0xe8] sm:$0xff]  ;;  %v1269_v12 = vld [vmem:[%s1693_s1 + $0x20] sm:$0xff]  ;;  %v1268_v16 = vld [vmem:[%s1693_s1 + $0x18] sm:$0xff] }
   0xa   :  { %646 = vmatpush.bf16.msra.mxu0 %v1271_v4  ;;  %v1277_v13 = vld [vmem:[%s1693_s1 + $0x60] sm:$0xff]  ;;  %v1276_v17 = vld [vmem:[%s1693_s1 + $0x58] sm:$0xff]  ;;  %v1267_v20 = vld [vmem:[%s1693_s1 + $0x10] sm:$0xff] }
   0xb   :  { %665 = vmatpush.bf16.msra.mxu1 %v1279_v5  ;;  %v1285_v14 = vld [vmem:[%s1693_s1 + $0xa0] sm:$0xff]  ;;  %v1284_v18 = vld [vmem:[%s1693_s1 + $0x98] sm:$0xff]  ;;  %v1275_v21 = vld [vmem:[%s1693_s1 + $0x50] sm:$0xff] }
   0xc   :  { %684 = vmatpush.bf16.msra.mxu2 %v1287_v6  ;;  %v1293_v15 = vld [vmem:[%s1693_s1 + $0xe0] sm:$0xff]  ;;  %v1292_v19 = vld [vmem:[%s1693_s1 + $0xd8] sm:$0xff]  ;;  %v1283_v22 = vld [vmem:[%s1693_s1 + $0x90] sm:$0xff] }
   0xd   :  { %703 = vmatpush.bf16.msra.mxu3 %v1295_v7  ;;  %v1291_v23 = vld [vmem:[%s1693_s1 + $0xd0] sm:$0xff]  ;;  %v1266_v24 = vld [vmem:[%s1693_s1 + $0x8] sm:$0xff]  ;;  %v1265_v28 = vld [vmem:[%s1693_s1] sm:$0xff] }
   0xe   :  { %647 = vmatpush.bf16.msra.mxu0 %v1270_v8  ;;  %v1274_v25 = vld [vmem:[%s1693_s1 + $0x48] sm:$0xff]  ;;  %v1273_v29 = vld [vmem:[%s1693_s1 + $0x40] sm:$0xff]  ;;  %v1320_v40 = vld [vmem:[%s1693_s1 + $0x1b8] sm:$0xff] }
   0xf   :  { %666 = vmatpush.bf16.msra.mxu1 %v1278_v9  ;;  %v1282_v26 = vld [vmem:[%s1693_s1 + $0x88] sm:$0xff]  ;;  %v1281_v30 = vld [vmem:[%s1693_s1 + $0x80] sm:$0xff]  ;;  %v1304_v41 = vld [vmem:[%s1693_s1 + $0x138] sm:$0xff] }
  0x10   :  { %685 = vmatpush.bf16.msra.mxu2 %v1286_v10  ;;  %v1290_v27 = vld [vmem:[%s1693_s1 + $0xc8] sm:$0xff]  ;;  %v1289_v31 = vld [vmem:[%s1693_s1 + $0xc0] sm:$0xff]  ;;  %v1312_v46 = vld [vmem:[%s1693_s1 + $0x178] sm:$0xff] }
  0x11   :  { %704 = vmatpush.bf16.msra.mxu3 %v1294_v11  ;;  %v899_v32 = vld [vmem:[%s1692_s0] sm:$0xf]  ;;  %v1249_v34 = vld [vmem:[%s1692_s0 + $0x4] sm:$0xf]  ;;  %v907_v36 = vld [vmem:[%s1692_s0 + $0x8] sm:$0xf] }
  0x12   :  { %648 = vmatpush.bf16.msra.mxu0 %v1269_v12  ;;  %v1253_v33 = vld [vmem:[%s1692_s0 + $0x1c] sm:$0xf0]  ;;  %v901_v35 = vld [vmem:[%s1692_s0 + $0x20] sm:$0xf0]  ;;  %v1254_v37 = vld [vmem:[%s1692_s0 + $0x24] sm:$0xf0] }
  0x13   :  { %667 = vmatpush.bf16.msra.mxu1 %v1277_v13  ;;  %v1250_v38 = vld [vmem:[%s1692_s0 + $0xc] sm:$0xf]  ;;  %v900_v42 = vor.u32 %v1253_v33, %v899_v32  ;;  %v904_v43 = vor.u32 %v1249_v34, %v901_v35  ;;  %v908_v44 = vor.u32 %v1254_v37, %v907_v36  ;;  %v1328_v47 = vld [vmem:[%s1693_s1 + $0x1f8] sm:$0xff]  ;;  %v1319_v48 = vld [vmem:[%s1693_s1 + $0x1b0] sm:$0xff] }
  0x14   :  { %686 = vmatpush.bf16.msra.mxu2 %v1285_v14  ;;  %v909_v39 = vld [vmem:[%s1692_s0 + $0x28] sm:$0xf0]  ;;  %v1303_v49 = vld [vmem:[%s1693_s1 + $0x130] sm:$0xff]  ;;  %v1317_v56 = vld [vmem:[%s1693_s1 + $0x1a0] sm:$0xff] }
  0x15   :  { %705 = vmatpush.bf16.msra.mxu3 %v1293_v15  ;;  %v912_v45 = vor.u32 %v1250_v38, %v909_v39  ;;  %v1311_v50 = vld [vmem:[%s1693_s1 + $0x170] sm:$0xff]  ;;  %v1318_v52 = vld [vmem:[%s1693_s1 + $0x1a8] sm:$0xff]  ;;  %v1301_v57 = vld [vmem:[%s1693_s1 + $0x120] sm:$0xff] }
  0x16   :  { %649 = vmatpush.bf16.msra.mxu0 %v1268_v16  ;;  %v1327_v51 = vld [vmem:[%s1693_s1 + $0x1f0] sm:$0xff]  ;;  %v1302_v53 = vld [vmem:[%s1693_s1 + $0x128] sm:$0xff]  ;;  %v1309_v58 = vld [vmem:[%s1693_s1 + $0x160] sm:$0xff] }
  0x17   :  { %668 = vmatpush.bf16.msra.mxu1 %v1276_v17  ;;  %v1310_v54 = vld [vmem:[%s1693_s1 + $0x168] sm:$0xff]  ;;  %v1325_v59 = vld [vmem:[%s1693_s1 + $0x1e0] sm:$0xff]  ;;  %v1316_v4 = vld [vmem:[%s1693_s1 + $0x198] sm:$0xff] }
  0x18   :  { %687 = vmatpush.bf16.msra.mxu2 %v1284_v18  ;;  %v1326_v55 = vld [vmem:[%s1693_s1 + $0x1e8] sm:$0xff]  ;;  %v931_v60 = vld [vmem:[%s1692_s0 + $0x40] sm:$0xf]  ;;  %v1257_v62 = vld [vmem:[%s1692_s0 + $0x44] sm:$0xf] }
  0x19   :  { %706 = vmatpush.bf16.msra.mxu3 %v1292_v19  ;;  %v1261_v61 = vld [vmem:[%s1692_s0 + $0x5c] sm:$0xf0]  ;;  %v933_v63 = vld [vmem:[%s1692_s0 + $0x60] sm:$0xf0]  ;;  %v939_v0 = vld [vmem:[%s1692_s0 + $0x48] sm:$0xf] }
  0x1a   :  { %650 = vmatpush.bf16.msra.mxu0 %v1267_v20  ;;  %v1262_v1 = vld [vmem:[%s1692_s0 + $0x64] sm:$0xf0]  ;;  %v1258_v2 = vld [vmem:[%s1692_s0 + $0x4c] sm:$0xf]  ;;  %v1300_v5 = vld [vmem:[%s1693_s1 + $0x118] sm:$0xff]  ;;  %v932_v6 = vor.u32 %v1261_v61, %v931_v60  ;;  %v936_v7 = vor.u32 %v1257_v62, %v933_v63 }
  0x1b   :  { %669 = vmatpush.bf16.msra.mxu1 %v1275_v21  ;;  %v941_v3 = vld [vmem:[%s1692_s0 + $0x68] sm:$0xf0]  ;;  %v940_v8 = vor.u32 %v1262_v1, %v939_v0  ;;  %v1308_v10 = vld [vmem:[%s1693_s1 + $0x158] sm:$0xff]  ;;  %v1315_v12 = vld [vmem:[%s1693_s1 + $0x190] sm:$0xff] }
  0x1c   :  { %688 = vmatpush.bf16.msra.mxu2 %v1283_v22  ;;  %v944_v9 = vor.u32 %v1258_v2, %v941_v3  ;;  %v1324_v11 = vld [vmem:[%s1693_s1 + $0x1d8] sm:$0xff]  ;;  %v1299_v13 = vld [vmem:[%s1693_s1 + $0x110] sm:$0xff]  ;;  %v1314_v16 = vld [vmem:[%s1693_s1 + $0x188] sm:$0xff] }
  0x1d   :  { %707 = vmatpush.bf16.msra.mxu3 %v1291_v23  ;;  %v1307_v14 = vld [vmem:[%s1693_s1 + $0x150] sm:$0xff]  ;;  %v1298_v17 = vld [vmem:[%s1693_s1 + $0x108] sm:$0xff]  ;;  %v1313_v20 = vld [vmem:[%s1693_s1 + $0x180] sm:$0xff] }
  0x1e   :  { %651 = vmatpush.bf16.msra.mxu0 %v1266_v24  ;;  %v1323_v15 = vld [vmem:[%s1693_s1 + $0x1d0] sm:$0xff]  ;;  %v1306_v18 = vld [vmem:[%s1693_s1 + $0x148] sm:$0xff]  ;;  %v1297_v21 = vld [vmem:[%s1693_s1 + $0x100] sm:$0xff] }
  0x1f   :  { %670 = vmatpush.bf16.msra.mxu1 %v1274_v25  ;;  %v1322_v19 = vld [vmem:[%s1693_s1 + $0x1c8] sm:$0xff]  ;;  %v1305_v22 = vld [vmem:[%s1693_s1 + $0x140] sm:$0xff]  ;;  %v915_v24 = vld [vmem:[%s1692_s0 + $0x10] sm:$0xf] }
  0x20   :  { %689 = vmatpush.bf16.msra.mxu2 %v1282_v26  ;;  %v1321_v23 = vld [vmem:[%s1693_s1 + $0x1c0] sm:$0xff]  ;;  %v1255_v25 = vld [vmem:[%s1692_s0 + $0x2c] sm:$0xf0]  ;;  %v1251_v26 = vld [vmem:[%s1692_s0 + $0x14] sm:$0xf] }
  0x21   :  { %708 = vmatpush.bf16.msra.mxu3 %v1290_v27  ;;  %v917_v27 = vld [vmem:[%s1692_s0 + $0x30] sm:$0xf0]  ;;  %v916_v32 = vor.u32 %v1255_v25, %v915_v24  ;;  %v947_v36 = vld [vmem:[%s1692_s0 + $0x50] sm:$0xf]  ;;  %v1334_v60 = vld [vmem:[#allocation2 + $0x28] sm:$0xff] }
  0x22   :  { %652 = vmatpush.bf16.msra.mxu0 %v1265_v28  ;;  %v923_v28 = vld [vmem:[%s1692_s0 + $0x18] sm:$0xf]  ;;  %v920_v33 = vor.u32 %v1251_v26, %v917_v27  ;;  %v1263_v37 = vld [vmem:[%s1692_s0 + $0x6c] sm:$0xf0]  ;;  %v1259_v38 = vld [vmem:[%s1692_s0 + $0x54] sm:$0xf] }
  0x23   :  { %671 = vmatpush.bf16.msra.mxu1 %v1273_v29  ;;  %v1256_v29 = vld [vmem:[%s1692_s0 + $0x34] sm:$0xf0]  ;;  %v949_v39 = vld [vmem:[%s1692_s0 + $0x70] sm:$0xf0]  ;;  %v1333_v61 = vld [vmem:[#allocation2 + $0x20] sm:$0xff] }
  0x24   :  { %690 = vmatpush.bf16.msra.mxu2 %v1281_v30  ;;  %v1252_v30 = vld [vmem:[%s1692_s0 + $0x1c] sm:$0xf]  ;;  %v924_v34 = vor.u32 %v1256_v29, %v923_v28  ;;  %v1331_v3 = vld [vmem:[#allocation2 + $0x10] sm:$0xff] }
  0x25   :  { %709 = vmatpush.bf16.msra.mxu3 %v1289_v31  ;;  %653 = vmatmul.bf16.vlgmr.msra.gmra.mxu0 %v900_v42  ;;  %v925_v31 = vld [vmem:[%s1692_s0 + $0x38] sm:$0xf0] }
  0x26   :  { %721 = vmatpush.bf16.msrb.mxu0 %v1304_v41  ;;  %672 = vmatmul.bf16.vlgmr.msra.gmra.mxu1 %v904_v43  ;;  %v928_v35 = vor.u32 %v1252_v30, %v925_v31  ;;  %v1264_v41 = vld [vmem:[%s1692_s0 + $0x74] sm:$0xf0]  ;;  %v1260_v42 = vld [vmem:[%s1692_s0 + $0x5c] sm:$0xf] }
  0x27   :  { %691 = vmatmul.bf16.vlgmr.msra.gmra.mxu2 %v908_v44  ;;  %740 = vmatpush.bf16.msrb.mxu1 %v1312_v46  ;;  %v957_v43 = vld [vmem:[%s1692_s0 + $0x78] sm:$0xf0]  ;;  %v948_v44 = vor.u32 %v1263_v37, %v947_v36 }
  0x28   :  { %759 = vmatpush.bf16.msrb.mxu2 %v1320_v40  ;;  %710 = vmatmul.bf16.vlgmr.msra.gmra.mxu3 %v912_v45  ;;  %v955_v40 = vld [vmem:[%s1692_s0 + $0x58] sm:$0xf]  ;;  %v952_v45 = vor.u32 %v1259_v38, %v949_v39 }
  0x29   :  { %778 = vmatpush.bf16.msrb.mxu3 %v1328_v47  ;;  %v956_v46 = vor.u32 %v1264_v41, %v955_v40  ;;  %v960_v47 = vor.u32 %v1260_v42, %v957_v43  ;;  %v1332_v2 = vld [vmem:[#allocation2 + $0x18] sm:$0xff] }
  0x2a   :  { %722 = vmatpush.bf16.msrb.mxu0 %v1303_v49 }
  0x2b   :  { %741 = vmatpush.bf16.msrb.mxu1 %v1311_v50 }
  0x2c   :  { %760 = vmatpush.bf16.msrb.mxu2 %v1319_v48 }
  0x2d   :  { %779 = vmatpush.bf16.msrb.mxu3 %v1327_v51 }
  0x2e   :  { %723 = vmatpush.bf16.msrb.mxu0 %v1302_v53 }
  0x2f   :  { %742 = vmatpush.bf16.msrb.mxu1 %v1310_v54  ;;  %v1336_v54 = vld [vmem:[#allocation2 + $0x38] sm:$0xff] }
  0x30   :  { %761 = vmatpush.bf16.msrb.mxu2 %v1318_v52 }
  0x31   :  { %780 = vmatpush.bf16.msrb.mxu3 %v1326_v55  ;;  %v1335_v55 = vld [vmem:[#allocation2 + $0x30] sm:$0xff] }
  0x32   :  { %724 = vmatpush.bf16.msrb.mxu0 %v1301_v57 }
  0x33   :  { %743 = vmatpush.bf16.msrb.mxu1 %v1309_v58 }
  0x34   :  { %762 = vmatpush.bf16.msrb.mxu2 %v1317_v56 }
  0x35   :  { %781 = vmatpush.bf16.msrb.mxu3 %v1325_v59  ;;  %658 = vmatmul.bf16.gmra.mxu0 %v932_v6 }
  0x36   :  { %725 = vmatpush.bf16.msrb.mxu0 %v1300_v5  ;;  %677 = vmatmul.bf16.gmra.mxu1 %v936_v7 }
  0x37   :  { %696 = vmatmul.bf16.gmra.mxu2 %v940_v8  ;;  %744 = vmatpush.bf16.msrb.mxu1 %v1308_v10  ;;  %v1330_v8 = vld [vmem:[#allocation2 + $0x8] sm:$0xff] }
  0x38   :  { %763 = vmatpush.bf16.msrb.mxu2 %v1316_v4  ;;  %715 = vmatmul.bf16.gmra.mxu3 %v944_v9  ;;  %v1340_v9 = vld [vmem:[%s1694_s2] ss:$0 sm:$0xff] }
  0x39   :  { %782 = vmatpush.bf16.msrb.mxu3 %v1324_v11  ;;  %v1329_v11 = vld [vmem:[#allocation2] sm:$0xff] }
  0x3a   :  { %726 = vmatpush.bf16.msrb.mxu0 %v1299_v13 }
  0x3b   :  { %745 = vmatpush.bf16.msrb.mxu1 %v1307_v14 }
  0x3c   :  { %764 = vmatpush.bf16.msrb.mxu2 %v1315_v12 }
  0x3d   :  { %783 = vmatpush.bf16.msrb.mxu3 %v1323_v15 }
  0x3e   :  { %727 = vmatpush.bf16.msrb.mxu0 %v1298_v17 }
  0x3f   :  { %746 = vmatpush.bf16.msrb.mxu1 %v1306_v18 }
  0x40   :  { %765 = vmatpush.bf16.msrb.mxu2 %v1314_v16 }
  0x41   :  { %784 = vmatpush.bf16.msrb.mxu3 %v1322_v19 }
  0x42   :  { %728 = vmatpush.bf16.msrb.mxu0 %v1297_v21 }
  0x43   :  { %747 = vmatpush.bf16.msrb.mxu1 %v1305_v22 }
  0x44   :  { %766 = vmatpush.bf16.msrb.mxu2 %v1313_v20 }
  0x45   :  { %785 = vmatpush.bf16.msrb.mxu3 %v1321_v23  ;;  %729 = vmatmul.bf16.vlgmr.msrb.gmra.mxu0 %v916_v32 }
  0x46   :  { %748 = vmatmul.bf16.vlgmr.msrb.gmra.mxu1 %v920_v33  ;;  %868 = vmatpush.bf16.msra.mxu0 %v1336_v54 }
  0x47   :  { %767 = vmatmul.bf16.vlgmr.msrb.gmra.mxu2 %v924_v34 }
  0x48   :  { %786 = vmatmul.bf16.vlgmr.msrb.gmra.mxu3 %v928_v35 }
  0x4a   :  { %869 = vmatpush.bf16.msra.mxu0 %v1335_v55 }
  0x4e   :  { %870 = vmatpush.bf16.msra.mxu0 %v1334_v60 }
  0x52   :  { %871 = vmatpush.bf16.msra.mxu0 %v1333_v61 }
  0x55   :  { %734 = vmatmul.bf16.gmra.mxu0 %v948_v44 }
  0x56   :  { %753 = vmatmul.bf16.gmra.mxu1 %v952_v45  ;;  %872 = vmatpush.bf16.msra.mxu0 %v1332_v2 }
  0x57   :  { %772 = vmatmul.bf16.gmra.mxu2 %v956_v46 }
  0x58   :  { %791 = vmatmul.bf16.gmra.mxu3 %v960_v47 }
  0x5a   :  { %873 = vmatpush.bf16.msra.mxu0 %v1331_v3 }
  0x5e   :  { %874 = vmatpush.bf16.msra.mxu0 %v1330_v8 }
  0x62   :  { %875 = vmatpush.bf16.msra.mxu0 %v1329_v11 }
  0xa2   :  { %v654_v48 = vpop.f32.mrf.mxu0 }
  0xa3   :  { %v673_v49 = vpop.f32.mrf.mxu1  ;;  %v655_v13 = vadd.f32 %v1340_v9, %v654_v48 }
  0xa5   :  { %v674_v19 = vadd.f32 %v673_v49, %v655_v13 }
  0xaa   :  { %v692_v50 = vpop.f32.mrf.mxu2  ;;  %v656_v52 = vpop.f32.mrf.mxu0 }
  0xab   :  { %v711_v51 = vpop.f32.mrf.mxu3  ;;  %v675_v53 = vpop.f32.mrf.mxu1  ;;  %v657_v17 = vadd.f32 %v1340_v9, %v656_v52  ;;  %v693_v24 = vadd.f32 %v692_v50, %v674_v19 }
  0xad   :  { %v676_v20 = vadd.f32 %v675_v53, %v657_v17  ;;  %v712_v31 = vadd.f32 %v711_v51, %v693_v24 }
  0xb2   :  { %v694_v56 = vpop.f32.mrf.mxu2  ;;  %v659_v58 = vpop.f32.mrf.mxu0 }
  0xb3   :  { %v713_v57 = vpop.f32.mrf.mxu3  ;;  %v678_v59 = vpop.f32.mrf.mxu1  ;;  %v660_v10 = vadd.f32 %v1340_v9, %v659_v58  ;;  %v695_v25 = vadd.f32 %v694_v56, %v676_v20 }
  0xb5   :  { %v679_v18 = vadd.f32 %v678_v59, %v660_v10  ;;  %v714_v32 = vadd.f32 %v713_v57, %v695_v25 }
  0xba   :  { %v697_v62 = vpop.f32.mrf.mxu2  ;;  %v661_v0 = vpop.f32.mrf.mxu0 }
  0xbb   :  { %v716_v63 = vpop.f32.mrf.mxu3  ;;  %v680_v1 = vpop.f32.mrf.mxu1  ;;  %v698_v21 = vadd.f32 %v697_v62, %v679_v18  ;;  %v662_v22 = vadd.f32 %v1340_v9, %v661_v0 }
  0xbd   :  { %v717_v28 = vadd.f32 %v716_v63, %v698_v21  ;;  %v681_v29 = vadd.f32 %v680_v1, %v662_v22 }
  0xc2   :  { %v699_v4 = vpop.f32.mrf.mxu2  ;;  %v730_v6 = vpop.f32.mrf.mxu0 }
  0xc3   :  { %v718_v5 = vpop.f32.mrf.mxu3  ;;  %v749_v7 = vpop.f32.mrf.mxu1  ;;  %v700_v33 = vadd.f32 %v699_v4, %v681_v29  ;;  %v731_v35 = vadd.f32 %v730_v6, %v712_v31 }
  0xc5   :  { %v719_v38 = vadd.f32 %v718_v5, %v700_v33  ;;  %v750_v42 = vadd.f32 %v749_v7, %v731_v35 }
  0xca   :  { %v768_v12 = vpop.f32.mrf.mxu2  ;;  %v732_v15 = vpop.f32.mrf.mxu0 }
  0xcb   :  { %v787_v14 = vpop.f32.mrf.mxu3  ;;  %v751_v16 = vpop.f32.mrf.mxu1  ;;  %v733_v36 = vadd.f32 %v732_v15, %v714_v32  ;;  %v769_v46 = vadd.f32 %v768_v12, %v750_v42 }
  0xcd   :  { %v752_v43 = vadd.f32 %v751_v16, %v733_v36  ;;  %v788_v52 = vadd.f32 %v787_v14, %v769_v46 }
  0xcf   :  { %v797_v58 = vmax.f32 %v788_v52, 0.0 }
  0xd2   :  { %v770_v23 = vpop.f32.mrf.mxu2  ;;  %v735_v27 = vpop.f32.mrf.mxu0 }
  0xd3   :  { %v789_v26 = vpop.f32.mrf.mxu3  ;;  %v754_v30 = vpop.f32.mrf.mxu1  ;;  %v736_v34 = vadd.f32 %v735_v27, %v717_v28  ;;  %v771_v47 = vadd.f32 %v770_v23, %v752_v43 }
  0xd5   :  { %v755_v39 = vadd.f32 %v754_v30, %v736_v34  ;;  %v790_v53 = vadd.f32 %v789_v26, %v771_v47 }
  0xd7   :  { %v798_v59 = vmax.f32 %v790_v53, 0.0 }
  0xda   :  { %v773_v37 = vpop.f32.mrf.mxu2  ;;  %v737_v41 = vpop.f32.mrf.mxu0 }
  0xdb   :  { %v792_v40 = vpop.f32.mrf.mxu3  ;;  %v774_v44 = vadd.f32 %v773_v37, %v755_v39  ;;  %v738_v45 = vadd.f32 %v737_v41, %v719_v38  ;;  %v756_v48 = vpop.f32.mrf.mxu1 }
  0xdd   :  { %v793_v49 = vadd.f32 %v792_v40, %v774_v44  ;;  %v757_v50 = vadd.f32 %v756_v48, %v738_v45 }
  0xdf   :  { %v799_v56 = vmax.f32 %v793_v49, 0.0 }
  0xe1   :  { %v801_v61 = vsub.f32 %v797_v58, %v799_v56 }
  0xe2   :  { %v775_v51 = vpop.f32.mrf.mxu2 }
  0xe3   :  { %v776_v54 = vadd.f32 %v775_v51, %v757_v50  ;;  %v794_v55 = vpop.f32.mrf.mxu3 }
  0xe5   :  { %v795_v57 = vadd.f32 %v794_v55, %v776_v54 }
  0xe7   :  { %v800_v60 = vmax.f32 %v795_v57, 0.0 }
  0xe9   :  { %v802_v62 = vsub.f32 %v798_v59, %v800_v60 }
  0xeb   :  { %v803_v63 = vpack.c.bf16 %v802_v62, %v801_v61 }
  0xed   :  { %876 = vmatmul.bf16.vlgmr.msra.gmra.mxu0 %v803_v63 }
 0x16a   :  { %v877_v0 = vpop.f32.mrf.mxu0 }
 0x16b   :  { %v882_v2 = vmul.f32 %v877_v0, %v877_v0 }
 0x172   :  { %v879_v1 = vpop.f32.mrf.mxu0 }
 0x173   :  { %v883_v3 = vmul.f32 %v879_v1, %v879_v1 }
 0x175   :  { %v884_v4 = vadd.f32 %v883_v3, %v882_v2 }
 0x177   :  { %v885_v5 = vrot.slane %v884_v4, 4 }
 0x179   :  { %v886_v6 = vadd.f32 %v885_v5, %v884_v4 }
 0x17b   :  { %v887_v7 = vrot.slane %v886_v6, 2 }
 0x17d   :  { %v888_v8 = vadd.f32 %v887_v7, %v886_v6 }
 0x17f   :  { %v889_v9 = vrot.slane %v888_v8, 1 }
 0x181   :  { %v890_v10 = vadd.f32 %v889_v9, %v888_v8 }
 0x183   :  { %891 = vst [vmem:[%s1696_s4] sm:$0x1] %v890_v10 }
 0x184   :  { %896 = vsyncpa [#allocation3], 1 }

</bundles_post_ra>
